<compile_context>
chip_gen: v7x
topology: tpu7x:2x2x1
jax: 0.10.0
libtpu: 0.0.40
codegen_flags: <defaults>
</compile_context>

<pallas_src>
import functools

import jax
import jax.numpy as jnp
from jax.experimental import pallas as pl
from jax.experimental.pallas import tpu as pltpu


def _embedder_kernel(patch_ref, wconv_ref, bconv_ref, whead_ref, bhead_ref,
                     out_ref, *, inv_hw):
    """One batch of the fused embedder: 3x3-conv GEMM + ReLU + avg-pool + head."""
    # Stem 3x3 conv as a single (HW, 27) @ (27, C_stem) GEMM (bf16 MXU, f32 acc).
    feat = jnp.dot(patch_ref[...], wconv_ref[...],
                   preferred_element_type=jnp.float32)
    feat = jnp.maximum(feat + bconv_ref[...], 0.0)          # conv bias + ReLU

    # AdaptiveAvgPool2d((1,1)): spatial mean over the H*W rows.
    pooled = jnp.sum(feat, axis=0, keepdims=True) * inv_hw  # (1, C_stem) f32

    # Head: BatchNorm1d (eval) pre-folded into whead/bhead; fp32 matmul.
    emb = jnp.dot(pooled, whead_ref[...],
                  preferred_element_type=jnp.float32) + bhead_ref[...]
    out_ref[...] = emb                                       # written once per batch


def _im2col_3x3(x_nhwc):
    """(B, H, W, Cin) -> (B, H*W, 9*Cin) patches for a 3x3 / stride-1 / pad-1 conv.

    Tap order is (kh major, kw minor, cin inner), matching
    w_conv.reshape(9*Cin, C_stem)."""
    B, H, W, Cin = x_nhwc.shape
    xp = jnp.pad(x_nhwc, ((0, 0), (1, 1), (1, 1), (0, 0)))
    taps = []
    for kh in range(3):
        for kw in range(3):
            taps.append(xp[:, kh:kh + H, kw:kw + W, :].reshape(B, H * W, Cin))
    return jnp.concatenate(taps, axis=-1)


def cnn_embedder_forward(images, params):
    """images: (B, C_in, H, W) float32 (NCHW, PyTorch convention). Returns (B, 1, D)."""
    B, Cin, H, W = images.shape
    KH = KW = 3
    HW = H * W
    K = KH * KW * Cin                                        # fused contraction dim

    # --- glue: NCHW -> NHWC -> lane-dense bf16 im2col patches ------------------
    x = jnp.transpose(images, (0, 2, 3, 1)).astype(jnp.float32)
    patches = _im2col_3x3(x).astype(jnp.bfloat16)            # (B, HW, 27)

    # --- glue: fused conv weight (27, C_stem), bf16 for the MXU ----------------
    w_conv = params["w_conv"].reshape(K, -1).astype(jnp.bfloat16)
    b_conv = params["b_conv"].astype(jnp.float32)            # (1, C_stem)
    C_stem = w_conv.shape[-1]

    # --- glue: fold eval-mode BatchNorm1d into the fp32 head Linear ------------
    eps = 1e-5
    bn_scale = params["bn_gamma"] / jnp.sqrt(params["bn_var"] + eps)    # (1, C_stem)
    bn_shift = params["bn_beta"] - params["bn_mean"] * bn_scale         # (1, C_stem)
    w_head = (bn_scale.reshape(-1, 1) * params["w_head"]).astype(jnp.float32)
    b_head = (bn_shift @ params["w_head"] + params["b_head"]).astype(jnp.float32)
    D = w_head.shape[-1]

    kernel = functools.partial(_embedder_kernel, inv_hw=1.0 / float(HW))

    grid_spec = pltpu.PrefetchScalarGridSpec(
        num_scalar_prefetch=0,
        grid=(B,),
        in_specs=[
            # One batch's patch tile per grid step; the next batch's DMA is
            # double-buffered behind the current batch's compute.
            pl.BlockSpec((None, HW, K), lambda b: (b, 0, 0)),
            pl.BlockSpec((K, C_stem), lambda b: (0, 0)),
            pl.BlockSpec((1, C_stem), lambda b: (0, 0)),
            pl.BlockSpec((C_stem, D), lambda b: (0, 0)),
            pl.BlockSpec((1, D), lambda b: (0, 0)),
        ],
        out_specs=pl.BlockSpec((None, 1, D), lambda b: (b, 0, 0)),
    )

    out = pl.pallas_call(
        kernel,
        out_shape=jax.ShapeDtypeStruct((B, 1, D), jnp.float32),
        grid_spec=grid_spec,
        compiler_params=pltpu.CompilerParams(
            dimension_semantics=("parallel",)),   # batch across TCs on v7x
    )(patches, w_conv, b_conv, w_head, b_head)

    # output_scale == 1.0 -> no scaling; extra head is None (extra_head_dim=0).
    return out


def make_params(key, c_in, c_stem, emb_dim):
    """Deterministic synthetic parameters (this is not a checkpoint load)."""
    k1, k2, k3, k4, k5 = jax.random.split(key, 5)
    KH = KW = 3
    fan_in_conv = KH * KW * c_in
    params = {
        # conv weight in HWIO layout (kh, kw, cin, c_stem).
        "w_conv": (jax.random.normal(k1, (KH, KW, c_in, c_stem), jnp.float32)
                   / jnp.sqrt(fan_in_conv)),
        "b_conv": jax.random.normal(k2, (1, c_stem), jnp.float32) * 0.1,
        # BatchNorm1d(c_stem) running stats + affine (eval mode).
        "bn_gamma": jnp.ones((1, c_stem), jnp.float32),
        "bn_beta": jnp.zeros((1, c_stem), jnp.float32),
        "bn_mean": jax.random.normal(k3, (1, c_stem), jnp.float32) * 0.1,
        "bn_var": jnp.ones((1, c_stem), jnp.float32)
                  + jax.random.uniform(k4, (1, c_stem), jnp.float32) * 0.5,
        # Linear(c_stem -> emb_dim); bias initialized to 0 (torch.nn.init.constant_).
        "w_head": (jax.random.normal(k5, (c_stem, emb_dim), jnp.float32)
                   / jnp.sqrt(c_stem)),
        "b_head": jnp.zeros((1, emb_dim), jnp.float32),
    }
    return params


def _reference_forward(images, params):
    """Plain-JAX reference (stem GEMM inputs cast to bf16 to match the kernel)."""
    B, Cin, H, W = images.shape
    hp = jax.lax.Precision.HIGHEST
    x = jnp.transpose(images, (0, 2, 3, 1)).astype(jnp.float32)
    patches = _im2col_3x3(x)
    patches = patches.astype(jnp.bfloat16).astype(jnp.float32)          # (B,HW,27)
    w = params["w_conv"].reshape(-1, params["w_conv"].shape[-1])
    w = w.astype(jnp.bfloat16).astype(jnp.float32)                       # (27, C)
    feat = jnp.einsum("bpk,kc->bpc", patches, w, precision=hp)
    feat = jnp.maximum(feat + params["b_conv"].reshape(1, 1, -1), 0.0)
    pooled = jnp.mean(feat, axis=1)                                      # (B, C_stem)
    eps = 1e-5
    normed = ((pooled - params["bn_mean"]) / jnp.sqrt(params["bn_var"] + eps)
              * params["bn_gamma"] + params["bn_beta"])
    emb = jnp.dot(normed, params["w_head"], precision=hp) + params["b_head"]
    return emb.reshape(B, 1, -1)


if __name__ == "__main__":
    B, C_IN, H, W = 2, 3, 16, 16      # CNNEmbedder.in_channels == 3
    C_STEM, EMB_DIM = 32, 8           # stem channels / distribution.num_parameters

    key = jax.random.PRNGKey(0)
    k_img, k_par = jax.random.split(key)
    images = jax.random.normal(k_img, (B, C_IN, H, W), jnp.float32)      # NCHW
    params = make_params(k_par, C_IN, C_STEM, EMB_DIM)

    out = cnn_embedder_forward(images, params)
    out = jax.block_until_ready(out)

    ref = jax.block_until_ready(_reference_forward(images, params))
    assert out.shape == (B, 1, EMB_DIM), out.shape
    assert jnp.allclose(out, ref, atol=2e-3, rtol=2e-3), \
        float(jnp.max(jnp.abs(out - ref)))

    print("KERNEL_OK")
</pallas_src>

<mosaic_0001>
module attributes {stable_mosaic.version = 11 : i64} {
  func.func @_embedder_kernel(%arg0: i32, %arg1: memref<1x256x27xbf16, #tpu.memory_space<vmem>>, %arg2: memref<27x32xbf16, #tpu.memory_space<vmem>>, %arg3: memref<1x32xf32, #tpu.memory_space<vmem>>, %arg4: memref<32x8xf32, #tpu.memory_space<vmem>>, %arg5: memref<1x8xf32, #tpu.memory_space<vmem>>, %arg6: memref<1x1x8xf32, #tpu.memory_space<vmem>>) attributes {dimension_semantics = [#tpu.dimension_semantics<parallel>], iteration_bounds = array<i64: 2>, scalar_prefetch = 0 : i64, scratch_operands = 0 : i64, tpu.core_type = #tpu.core_type<tc>, window_params = [{transform_indices = @transform_0, window_bounds = array<i64: 1, 256, 27>}, {pipeline_mode = #tpu.pipeline_mode<synchronous>, transform_indices = @transform_1, window_bounds = array<i64: 27, 32>}, {pipeline_mode = #tpu.pipeline_mode<synchronous>, transform_indices = @transform_2, window_bounds = array<i64: 1, 32>}, {pipeline_mode = #tpu.pipeline_mode<synchronous>, transform_indices = @transform_3, window_bounds = array<i64: 32, 8>}, {pipeline_mode = #tpu.pipeline_mode<synchronous>, transform_indices = @transform_4, window_bounds = array<i64: 1, 8>}, {transform_indices = @transform_5, window_bounds = array<i64: 1, 1, 8>}]} {
    %c0 = arith.constant 0 : index
    %c0_0 = arith.constant 0 : index
    %c0_1 = arith.constant 0 : index
    %0 = vector.load %arg1[%c0, %c0_0, %c0_1] : memref<1x256x27xbf16, #tpu.memory_space<vmem>>, vector<1x256x27xbf16>
    %1 = vector.shape_cast %0 : vector<1x256x27xbf16> to vector<256x27xbf16>
    %c0_2 = arith.constant 0 : index
    %c0_3 = arith.constant 0 : index
    %2 = vector.load %arg2[%c0_2, %c0_3] : memref<27x32xbf16, #tpu.memory_space<vmem>>, vector<27x32xbf16>
    %cst = arith.constant dense<0.000000e+00> : vector<256x32xf32>
    %3 = tpu.matmul %1, %2, %cst {dimension_numbers = #tpu.dot_dimension_numbers<[1], [0], [0], [1], [0, 0, 1, 1], [], []>} : vector<256x27xbf16>, vector<27x32xbf16>, vector<256x32xf32> -> vector<256x32xf32>
    %c0_4 = arith.constant 0 : index
    %c0_5 = arith.constant 0 : index
    %4 = vector.load %arg3[%c0_4, %c0_5] : memref<1x32xf32, #tpu.memory_space<vmem>>, vector<1x32xf32>
    %5 = vector.broadcast %4 : vector<1x32xf32> to vector<256x32xf32>
    %6 = arith.addf %3, %5 : vector<256x32xf32>
    %cst_6 = arith.constant 0.000000e+00 : f32
    %7 = vector.broadcast %cst_6 : f32 to vector<256x32xf32>
    %8 = arith.maximumf %6, %7 : vector<256x32xf32>
    %cst_7 = arith.constant dense<0.000000e+00> : vector<32xf32>
    %9 = vector.multi_reduction <add>, %8, %cst_7 [0] : vector<256x32xf32> to vector<32xf32>
    %10 = vector.shape_cast %9 : vector<32xf32> to vector<1x32xf32>
    %cst_8 = arith.constant 3.906250e-03 : f32
    %11 = vector.broadcast %cst_8 : f32 to vector<1x32xf32>
    %12 = arith.mulf %10, %11 : vector<1x32xf32>
    %c0_9 = arith.constant 0 : index
    %c0_10 = arith.constant 0 : index
    %13 = vector.load %arg4[%c0_9, %c0_10] : memref<32x8xf32, #tpu.memory_space<vmem>>, vector<32x8xf32>
    %cst_11 = arith.constant dense<0.000000e+00> : vector<1x8xf32>
    %14 = tpu.matmul %12, %13, %cst_11 {dimension_numbers = #tpu.dot_dimension_numbers<[1], [0], [0], [1], [0, 0, 1, 1], [], []>} : vector<1x32xf32>, vector<32x8xf32>, vector<1x8xf32> -> vector<1x8xf32>
    %c0_12 = arith.constant 0 : index
    %c0_13 = arith.constant 0 : index
    %15 = vector.load %arg5[%c0_12, %c0_13] : memref<1x8xf32, #tpu.memory_space<vmem>>, vector<1x8xf32>
    %16 = arith.addf %14, %15 : vector<1x8xf32>
    %c0_14 = arith.constant 0 : index
    %c0_15 = arith.constant 0 : index
    %c0_16 = arith.constant 0 : index
    %17 = vector.load %arg6[%c0_14, %c0_15, %c0_16] : memref<1x1x8xf32, #tpu.memory_space<vmem>>, vector<1x1x8xf32>
    %18 = vector.shape_cast %17 : vector<1x1x8xf32> to vector<1x8xf32>
    %19 = vector.shape_cast %16 : vector<1x8xf32> to vector<1x1x8xf32>
    tpu.vector_store %arg6[%c0_14, %c0_15, %c0_16], %19 {strides = array<i32>} : memref<1x1x8xf32, #tpu.memory_space<vmem>>, vector<1x1x8xf32>,
    return
  }
  func.func @transform_0(%arg0: i32) -> (i32, i32, i32) {
    %c0_i32 = arith.constant 0 : i32
    %c0_i32_0 = arith.constant 0 : i32
    %c0_i32_1 = arith.constant 0 : i32
    return %arg0, %c0_i32, %c0_i32_0 : i32, i32, i32
  }
  func.func @transform_1(%arg0: i32) -> (i32, i32) {
    %c0_i32 = arith.constant 0 : i32
    %c0_i32_0 = arith.constant 0 : i32
    %c0_i32_1 = arith.constant 0 : i32
    return %c0_i32, %c0_i32_0 : i32, i32
  }
  func.func @transform_2(%arg0: i32) -> (i32, i32) {
    %c0_i32 = arith.constant 0 : i32
    %c0_i32_0 = arith.constant 0 : i32
    %c0_i32_1 = arith.constant 0 : i32
    return %c0_i32, %c0_i32_0 : i32, i32
  }
  func.func @transform_3(%arg0: i32) -> (i32, i32) {
    %c0_i32 = arith.constant 0 : i32
    %c0_i32_0 = arith.constant 0 : i32
    %c0_i32_1 = arith.constant 0 : i32
    return %c0_i32, %c0_i32_0 : i32, i32
  }
  func.func @transform_4(%arg0: i32) -> (i32, i32) {
    %c0_i32 = arith.constant 0 : i32
    %c0_i32_0 = arith.constant 0 : i32
    %c0_i32_1 = arith.constant 0 : i32
    return %c0_i32, %c0_i32_0 : i32, i32
  }
  func.func @transform_5(%arg0: i32) -> (i32, i32, i32) {
    %c0_i32 = arith.constant 0 : i32
    %c0_i32_0 = arith.constant 0 : i32
    %c0_i32_1 = arith.constant 0 : i32
    return %arg0, %c0_i32, %c0_i32_0 : i32, i32, i32
  }
}

</mosaic_0001>

<bundles_post_ra>
// kernel: tpu_custom_call.1
= control target key start
LH: loop header
LB: loop body
LE: loop exit
PB: predicated region body
PF: predicated region fallthrough
CT: control target
= control target key end

     0   :  { %10 = vsyncpa [#allocation3], 0  ;;  %s1366_s0 = inlined_call_operand.vmem [shape: bf16[2,256,27], index: 0, kind: input, shape index: {}]   ;;  %s1367_s1 = inlined_call_operand.vmem [shape: bf16[27,32], index: 1, kind: input, shape index: {}]   ;;  %s1368_s2 = inlined_call_operand.vmem [shape: f32[1,32], index: 2, kind: input, shape index: {}]   ;;  %s1369_s3 = inlined_call_operand.vmem [shape: f32[32,8], index: 3, kind: input, shape index: {}]   ;;  %s1370_s4 = inlined_call_operand.vmem [shape: f32[1,8], index: 4, kind: input, shape index: {}]   ;;  %s1371_s5 = inlined_call_operand.hbm [shape: f32[2,1,8], index: 5, kind: output, shape index: {}]  }
   0x1   :  { %12 = vsyncpa [#allocation3 + $0x1], 0  ;;  %s1111_s18 = smov 0   ;;  %s1113_s19 = smov 0  }
   0x2   :  { %s1115_s20 = smov 0   ;;  %s1117_s21 = smov 0  }
   0x3 LB: > { %s1132_s22 = sadd.s32 4294967295, %s1074_s21   ;;  %s825_s23 = sadd.s32 4294967294, %s1074_s21   ;;  %s1074_s21 = sphi %s1117_s21, %s1377_s21   ;;  %s1070_s20 = sphi %s1115_s20, %s1376_s20   ;;  %s1066_s19 = sphi %s1113_s19, %s1375_s19   ;;  %s1062_s18 = sphi %s1111_s18, %s1374_s18  }
   0x4   : > { %s1136_s24 = sadd.s32 1, %s1074_s21   ;;  %s135_s25 = sadd.s32 1, %s1070_s20 }
   0x5   : > { %s132_s26 = ssub.s32 %s1074_s21, %s1136_s24  ;;  %p145_p0 = scmp.ne.s32.totalorder %s1070_s20, %s1066_s19 }
   0x6   : > { %p133_p1 = scmp.eq.s32.totalorder %s132_s26, 0  ;;  %p146_p2 = scmp.eq.s32.totalorder %s1132_s22, 1 }
   0x7   : > { %p151_p3 = scmp.ne.s32.totalorder %s1066_s19, %s1062_s18  ;;  %p152_p4 = scmp.eq.s32.totalorder %s825_s23, 1 }
   0x8   : > { %s1147_s27 = scalar_select %p133_p1, %s1070_s20, %s135_s25  }
   0x9   : > { %p1149_p5 = por %p146_p2, %p145_p0  ;;  %p1153_p6 = por %p152_p4, %p151_p3 }
   0xa   : > { %p828_p7 = scmp.ge.s32.totalorder %s1074_s21, 1  ;;  %p190_p8 = scmp.lt.s32.totalorder %s1074_s21, 3 }
   0xc   : > { %p191_p9 = pnand %p828_p7, %p190_p8 }
   0xd   : > { %v994_v0 = vld [vmem:[%s1367_s1] sm:$0xff] (!%p191_p9)   ;;  %vm406_vm0 = vcmask (!%p191_p9), 1044480   ;;  %v995_v1 = vld [vmem:[%s1367_s1 + $0x8] sm:$0x3f] (!%p191_p9)   ;;  %vm407_vm1 = vcmask (!%p191_p9), 1045504   ;;  %p217_p10 = scmp.lt.s32.totalorder (!%p191_p9), %s1132_s22, 1 }
   0xe   : > { %194 = sbr.rel (%p191_p9) target bundleno = 551 (0x227), region = 40  ;;  %894 = vmatprep.subr.bf16.mxu0 (!%p191_p9), %v994_v0  ;;  %947 = vmatprep.subr.bf16.mxu1 (!%p191_p9), %v994_v0  ;;  %v1076_v2 = vmov (!%p191_p9), 65535   ;;  %vm357_vm2 = vcmask (!%p191_p9), 220160   ;;  %v677_v22 = vld [vmem:[%s1369_s3] sm:$0xff] (!%p191_p9)  ;;  %v678_v23 = vld [vmem:[%s1369_s3 + $0x8] sm:$0xff] (!%p191_p9)  ;;  %v1077_v25 = vmov (!%p191_p9), 0.0|0.0  }
   0xf   : > { %895 = vmatpush3.bf16.msra.mxu0 (!%p191_p9), %v994_v0  ;;  %v408_v3 = vsel (!%p191_p9), %vm406_vm0, 4294967295, %v1076_v2  ;;  %949 = vmatpush3.bf16.msra.mxu1 (!%p191_p9), %v994_v0  ;;  %v942_v24 = vpack.c.bf16 (!%p191_p9), %v678_v23, %v677_v22  ;;  %v679_v26 = vld [vmem:[%s1369_s3 + $0x10] sm:$0xff] (!%p191_p9)  ;;  %v680_v27 = vld [vmem:[%s1369_s3 + $0x18] sm:$0xff] (!%p191_p9)  ;;  %vm1078_vm3 = vmmov (!%p191_p9), 0   ;;  %v1079_v29 = vmov (!%p191_p9), 0.0   ;;  %s215_s8 = sand.u32 (!%p191_p9), 1, %s1066_s19  }
  0x10   : > { %v409_v4 = vsel (!%p191_p9), %vm407_vm1, %v408_v3, 0  ;;  %v945_v28 = vpack.c.bf16 (!%p191_p9), %v680_v27, %v679_v26  ;;  %v1219_v30 = vld [vmem:[%s1368_s2] ss:$0 sm:$0xff] (!%p191_p9)  ;;  %vm606_vm4 = vcmask (!%p191_p9), 261120   ;;  %s867_s11 = sshll.u32 (!%p191_p9), %s1132_s22, 4  ;;  %s216_s12 = scalar_lea.vmem (!%p191_p9), [#allocation2], %s215_s8 }
  0x11   : > { %v411_v5 = vand.u32 (!%p191_p9), %v995_v1, %v409_v4  ;;  %vm755_vm5 = vcmask (!%p191_p9), 57344   ;;  %s1324_s16 = scalar_lea.hbm (!%p191_p9), %s1371_s5, %s867_s11  ;;  %s758_s17 = scalar_lea.sflag (!%p191_p9), [#allocation3], %s215_s8 }
  0x13   : > { %896 = vmatprep.subr.bf16.mxu0 (!%p191_p9), %v411_v5  ;;  %948 = vmatprep.subr.bf16.mxu1 (!%p191_p9), %v411_v5 }
  0x14   : > { %897 = vmatpush3.bf16.msra.mxu0 (!%p191_p9), %v411_v5  ;;  %950 = vmatpush3.bf16.msra.mxu1 (!%p191_p9), %v411_v5 }
  0x15   : > { %s218_s9 = scalar_select %p217_p10, %s1132_s22, 1  ;;  %941 = vmatprep.subr.bf16.mxu1 %v1077_v25 }
  0x16   : > { %s1080_s22 = smov [#allocation2]  }
  0x17   : > { %s870_s10 = sshll.u32 %s218_s9, 7  ;;  %s1016_s25 = sshll.u32 %s1080_s22, 4  ;;  %s1017_s25 = int_to_ptr.vmem [resolvable:$false] %s1016_s25 }
  0x18   : > { %s1170_s13 = scalar_lea.vmem %s1366_s0, %s870_s10  ;;  %s1018_s26 = scalar_lea.vmem %s1017_s25, 32 }
  0x19   : > { %v996_v6 = vld [vmem:[%s1170_s13] sm:$0xff]   ;;  %v997_v7 = vld [vmem:[%s1170_s13 + $0x8] sm:$0xff]   ;;  %v998_v8 = vld [vmem:[%s1170_s13 + $0x10] sm:$0xff]  }
  0x1a   : > { %898 = vmatprep.mubr.msk.bf16.mxu0 %vm357_vm2, %v996_v6  ;;  %v999_v9 = vld [vmem:[%s1170_s13 + $0x18] sm:$0xff]   ;;  %v1000_v10 = vld [vmem:[%s1170_s13 + $0x20] sm:$0xff]   ;;  %v1006_v11 = vld [vmem:[%s1170_s13 + $0x50] sm:$0xff]  }
  0x1b   : > { %899 = vmatmul.mubr.msk.bf16.vlgmr.msra.gmra.mrb[0].mxu0 %vm357_vm2, %v997_v7  ;;  %v1007_v12 = vld [vmem:[%s1170_s13 + $0x58] sm:$0xff]   ;;  %918 = vmatprep.mubr.msk.bf16.mxu1 %vm357_vm2, %v1006_v11  ;;  %v1008_v13 = vld [vmem:[%s1170_s13 + $0x60] sm:$0xff]   ;;  %v1001_v14 = vld [vmem:[%s1170_s13 + $0x28] sm:$0xff]  }
  0x1c   : > { %902 = vmatprep.mubr.msk.bf16.mxu0 %vm357_vm2, %v998_v8  ;;  %919 = vmatmul.mubr.msk.bf16.vlgmr.msra.gmra.mrb[0].mxu1 %vm357_vm2, %v1007_v12  ;;  %v1002_v15 = vld [vmem:[%s1170_s13 + $0x30] sm:$0xff]   ;;  %v1009_v16 = vld [vmem:[%s1170_s13 + $0x68] sm:$0xff]   ;;  %v1003_v18 = vld [vmem:[%s1170_s13 + $0x38] sm:$0xff]  }
  0x1d   : > { %922 = vmatprep.mubr.msk.bf16.mxu1 %vm357_vm2, %v1008_v13  ;;  %v1010_v17 = vld [vmem:[%s1170_s13 + $0x70] sm:$0xff]   ;;  %v1004_v19 = vld [vmem:[%s1170_s13 + $0x40] sm:$0xff]   ;;  %v1011_v20 = vld [vmem:[%s1170_s13 + $0x78] sm:$0xff]   ;;  %943 = vmatpush3.bf16.msra.mxu1 %v942_v24 }
  0x1e   : > { %v1005_v21 = vld [vmem:[%s1170_s13 + $0x48] sm:$0xff]   ;;  %944 = vmatprep.subr.bf16.mxu1 %v1077_v25  ;;  %s770_s13 = sshll.u32 %s216_s12, 4  ;;  %s1326_s13 = int_to_ptr.vmem [resolvable:$true] %s770_s13 }
  0x1f   : > { %s1012_s23 = scalar_lea.vmem %s1326_s13, 16  ;;  %p1019_p0 = scmp.lt.s32.totalorder %s1326_s13, %s1017_s25 }
  0x20   : > { %p1013_p11 = scmp.ne.s32.totalorder %s1326_s13, %s1012_s23  ;;  %p1020_p1 = scmp.lt.s32.totalorder %s1018_s26, %s1012_s23 }
  0x21   : > { %946 = vmatpush3.bf16.msra.mxu1 %v945_v28 }
  0x22   : > { %p1014_p12 = pnand %p1013_p11, %p1149_p5  ;;  %p1021_p2 = por %p1020_p1, %p1019_p0 }
  0x23   : > { %903 = vmatmul.mubr.msk.bf16.gmra.mrb[4].mxu0 %vm357_vm2, %v999_v9 }
  0x24   : > { %906 = vmatprep.mubr.msk.bf16.mxu0 %vm357_vm2, %v1000_v10  ;;  %923 = vmatmul.mubr.msk.bf16.gmra.mrb[4].mxu1 %vm357_vm2, %v1009_v16  ;;  %p1015_p13 = pneg %p1014_p12 }
  0x25   : > { %926 = vmatprep.mubr.msk.bf16.mxu1 %vm357_vm2, %v1010_v17 }
  0x26   : > { %p1022_p3 = pnand %p1021_p2, %p1015_p13 }
  0x2b   : > { %907 = vmatmul.mubr.msk.bf16.gmra.mrb[8].mxu0 %vm357_vm2, %v1001_v14 }
  0x2c   : > { %910 = vmatprep.mubr.msk.bf16.mxu0 %vm357_vm2, %v1002_v15  ;;  %927 = vmatmul.mubr.msk.bf16.gmra.mrb[8].mxu1 %vm357_vm2, %v1011_v20 }
  0x2d   : > { %938 = vmatprep.mubr.msk.f32.mxu1 %vm1078_vm3, %v1079_v29 }
  0x33   : > { %911 = vmatmul.mubr.msk.bf16.gmra.mrb[12].mxu0 %vm357_vm2, %v1003_v18 }
  0x34   : > { %914 = vmatprep.mubr.msk.bf16.mxu0 %vm357_vm2, %v1004_v19 }
  0x3b   : > { %915 = vmatmul.mubr.msk.bf16.gmra.mrb[16].mxu0 %vm357_vm2, %v1005_v21 }
  0xee   : > { %v900_v31 = vpop.f32.mrb[0].mxu0 }
  0xef   : > { %v447_v32 = vpop.f32.mrb[1].mxu0  ;;  %v456_v33 = vadd.f32 %v900_v31, %v1219_v30  ;;  %v1230_v52 = vpop.f32.mrb[0].mxu1 }
  0xf0   : > { %v448_v34 = vadd.f32 %v1219_v30, %v447_v32  ;;  %v901_v35 = vpop.f32.mrb[2].mxu0  ;;  %v1232_v55 = vpop.f32.mrb[1].mxu1 }
  0xf1   : > { %v450_v36 = vpop.f32.mrb[3].mxu0  ;;  %v459_v38 = vadd.f32 %v901_v35, %v1219_v30  ;;  %v576_v40 = vmax.f32 %v456_v33, 0.0  ;;  %v1237_v60 = vpop.f32.mrb[2].mxu1 }
  0xf2   : > { %v574_v37 = vmax.f32 %v448_v34, 0.0  ;;  %v451_v39 = vadd.f32 %v1219_v30, %v450_v36  ;;  %v1239_v62 = vpop.f32.mrb[3].mxu1 }
  0xf3   : > { %v577_v43 = vmax.f32 %v459_v38, 0.0  ;;  %v610_v48 = vsel %vm606_vm4, %v576_v40, 0.0 }
  0xf4   : > { %v575_v41 = vmax.f32 %v451_v39, 0.0  ;;  %v607_v42 = vsel %vm606_vm4, %v574_v37, 0.0 }
  0xf5   : > { %v612_v56 = vsel %vm606_vm4, %v577_v43, 0.0 }
  0xf6   : > { %v608_v44 = vsel %vm606_vm4, %v575_v41, 0.0  ;;  %v904_v45 = vpop.f32.mrb[4].mxu0 }
  0xf7   : > { %v609_v46 = vadd.f32 %v608_v44, %v607_v42  ;;  %v463_v47 = vpop.f32.mrb[5].mxu0  ;;  %v472_v49 = vadd.f32 %v904_v45, %v1219_v30  ;;  %v1246_v12 = vpop.f32.mrb[4].mxu1 }
  0xf8   : > { %v464_v50 = vadd.f32 %v1219_v30, %v463_v47  ;;  %v905_v51 = vpop.f32.mrb[6].mxu0  ;;  %v1248_v15 = vpop.f32.mrb[5].mxu1 }
  0xf9   : > { %v611_v53 = vadd.f32 %v610_v48, %v609_v46  ;;  %v466_v54 = vpop.f32.mrb[7].mxu0  ;;  %v475_v58 = vadd.f32 %v905_v51, %v1219_v30  ;;  %v580_v63 = vmax.f32 %v472_v49, 0.0  ;;  %v1253_v20 = vpop.f32.mrb[6].mxu1 }
  0xfa   : > { %v578_v57 = vmax.f32 %v464_v50, 0.0  ;;  %v467_v59 = vadd.f32 %v1219_v30, %v466_v54  ;;  %v1255_v22 = vpop.f32.mrb[7].mxu1 }
  0xfb   : > { %v613_v61 = vadd.f32 %v612_v56, %v611_v53  ;;  %v581_v3 = vmax.f32 %v475_v58, 0.0  ;;  %v618_v8 = vsel %vm606_vm4, %v580_v63, 0.0 }
  0xfc   : > { %v614_v0 = vsel %vm606_vm4, %v578_v57, 0.0  ;;  %v579_v1 = vmax.f32 %v467_v59, 0.0 }
  0xfd   : > { %v615_v2 = vadd.f32 %v614_v0, %v613_v61  ;;  %v620_v16 = vsel %vm606_vm4, %v581_v3, 0.0  ;;  %v528_v3 = vadd.f32 %v1219_v30, %v1232_v55  ;;  %v531_v55 = vadd.f32 %v1219_v30, %v1239_v62 }
  0xfe   : > { %v616_v4 = vsel %vm606_vm4, %v579_v1, 0.0  ;;  %v908_v5 = vpop.f32.mrb[8].mxu0 }
  0xff   : > { %v617_v6 = vadd.f32 %v616_v4, %v615_v2  ;;  %v479_v7 = vpop.f32.mrb[9].mxu0  ;;  %v488_v9 = vadd.f32 %v908_v5, %v1219_v30  ;;  %v1262_v37 = vpop.f32.mrb[8].mxu1 }
 0x100   : > { %v480_v10 = vadd.f32 %v1219_v30, %v479_v7  ;;  %v909_v11 = vpop.f32.mrb[10].mxu0  ;;  %v559_v40 = vpop.f32.mrb[9].mxu1 }
 0x101   : > { %v619_v13 = vadd.f32 %v618_v8, %v617_v6  ;;  %v482_v14 = vpop.f32.mrb[11].mxu0  ;;  %v491_v18 = vadd.f32 %v909_v11, %v1219_v30  ;;  %v584_v23 = vmax.f32 %v488_v9, 0.0  ;;  %v1267_v45 = vpop.f32.mrb[10].mxu1 }
 0x102   : > { %v582_v17 = vmax.f32 %v480_v10, 0.0  ;;  %v483_v19 = vadd.f32 %v1219_v30, %v482_v14  ;;  %v562_v47 = vpop.f32.mrb[11].mxu1 }
 0x103   : > { %v621_v21 = vadd.f32 %v620_v16, %v619_v13  ;;  %v585_v27 = vmax.f32 %v491_v18, 0.0  ;;  %v626_v33 = vsel %vm606_vm4, %v584_v23, 0.0 }
 0x104   : > { %v622_v24 = vsel %vm606_vm4, %v582_v17, 0.0  ;;  %v583_v25 = vmax.f32 %v483_v19, 0.0  ;;  %v594_v17 = vmax.f32 %v528_v3, 0.0 }
 0x105   : > { %v623_v26 = vadd.f32 %v622_v24, %v621_v21  ;;  %v628_v41 = vsel %vm606_vm4, %v585_v27, 0.0  ;;  %v536_v21 = vadd.f32 %v1230_v52, %v1219_v30  ;;  %v539_v24 = vadd.f32 %v1237_v60, %v1219_v30 }
 0x106   : > { %v624_v28 = vsel %vm606_vm4, %v583_v25, 0.0  ;;  %v912_v29 = vpop.f32.mrb[12].mxu0  ;;  %v595_v27 = vmax.f32 %v531_v55, 0.0  ;;  %v547_v52 = vadd.f32 %v1219_v30, %v1255_v22 }
 0x107   : > { %v625_v31 = vadd.f32 %v624_v28, %v623_v26  ;;  %v495_v32 = vpop.f32.mrb[13].mxu0  ;;  %v504_v34 = vadd.f32 %v912_v29, %v1219_v30  ;;  %v646_v26 = vsel %vm606_vm4, %v594_v17, 0.0  ;;  %v544_v28 = vadd.f32 %v1219_v30, %v1248_v15 }
 0x108   : > { %v496_v35 = vadd.f32 %v1219_v30, %v495_v32  ;;  %v913_v36 = vpop.f32.mrb[14].mxu0  ;;  %v596_v62 = vmax.f32 %v536_v21, 0.0  ;;  %v597_v32 = vmax.f32 %v539_v24, 0.0 }
 0x109   : > { %v627_v38 = vadd.f32 %v626_v33, %v625_v31  ;;  %v498_v39 = vpop.f32.mrb[15].mxu0  ;;  %v507_v43 = vadd.f32 %v913_v36, %v1219_v30  ;;  %v588_v48 = vmax.f32 %v504_v34, 0.0  ;;  %v648_v33 = vsel %vm606_vm4, %v595_v27, 0.0 }
 0x10a   : > { %v586_v42 = vmax.f32 %v496_v35, 0.0  ;;  %v499_v44 = vadd.f32 %v1219_v30, %v498_v39  ;;  %v598_v34 = vmax.f32 %v544_v28, 0.0  ;;  %v650_v60 = vsel %vm606_vm4, %v596_v62, 0.0 }
 0x10b   : > { %v629_v46 = vadd.f32 %v628_v41, %v627_v38  ;;  %v589_v53 = vmax.f32 %v507_v43, 0.0  ;;  %v634_v59 = vsel %vm606_vm4, %v588_v48, 0.0  ;;  %v552_v36 = vadd.f32 %v1246_v12, %v1219_v30 }
 0x10c   : > { %v630_v49 = vsel %vm606_vm4, %v586_v42, 0.0  ;;  %v587_v50 = vmax.f32 %v499_v44, 0.0  ;;  %v652_v38 = vsel %vm606_vm4, %v597_v32, 0.0  ;;  %v654_v15 = vsel %vm606_vm4, %v598_v34, 0.0 }
 0x10d   : > { %v631_v51 = vadd.f32 %v630_v49, %v629_v46  ;;  %v636_v4 = vsel %vm606_vm4, %v589_v53, 0.0  ;;  %v555_v41 = vadd.f32 %v1253_v20, %v1219_v30  ;;  %v599_v42 = vmax.f32 %v547_v52, 0.0 }
 0x10e   : > { %v632_v54 = vsel %vm606_vm4, %v587_v50, 0.0  ;;  %v916_v56 = vpop.f32.mrb[16].mxu0  ;;  %v560_v43 = vadd.f32 %v1219_v30, %v559_v40  ;;  %v600_v46 = vmax.f32 %v552_v36, 0.0  ;;  %v563_v12 = vadd.f32 %v1219_v30, %v562_v47 }
 0x10f   : > { %v633_v57 = vadd.f32 %v632_v54, %v631_v51  ;;  %v511_v58 = vpop.f32.mrb[17].mxu0  ;;  %v520_v61 = vadd.f32 %v916_v56, %v1219_v30  ;;  %v601_v48 = vmax.f32 %v555_v41, 0.0  ;;  %v656_v49 = vsel %vm606_vm4, %v599_v42, 0.0 }
 0x110   : > { %v512_v63 = vadd.f32 %v1219_v30, %v511_v58  ;;  %v917_v0 = vpop.f32.mrb[18].mxu0  ;;  %v602_v50 = vmax.f32 %v560_v43, 0.0  ;;  %v658_v53 = vsel %vm606_vm4, %v600_v46, 0.0  ;;  %v568_v54 = vadd.f32 %v1262_v37, %v1219_v30 }
 0x111   : > { %v635_v1 = vadd.f32 %v634_v59, %v633_v57  ;;  %v514_v2 = vpop.f32.mrb[19].mxu0  ;;  %v523_v6 = vadd.f32 %v917_v0, %v1219_v30  ;;  %v592_v9 = vmax.f32 %v520_v61, 0.0  ;;  %v660_v20 = vsel %vm606_vm4, %v601_v48, 0.0 }
 0x112   : > { %v590_v5 = vmax.f32 %v512_v63, 0.0  ;;  %v515_v7 = vadd.f32 %v1219_v30, %v514_v2  ;;  %v662_v40 = vsel %vm606_vm4, %v602_v50, 0.0  ;;  %v571_v57 = vadd.f32 %v1267_v45, %v1219_v30 }
 0x113   : > { %v637_v8 = vadd.f32 %v636_v4, %v635_v1  ;;  %v593_v14 = vmax.f32 %v523_v6, 0.0  ;;  %v642_v19 = vsel %vm606_vm4, %v592_v9, 0.0  ;;  %v603_v58 = vmax.f32 %v563_v12, 0.0 }
 0x114   : > { %v638_v10 = vsel %vm606_vm4, %v590_v5, 0.0  ;;  %v591_v11 = vmax.f32 %v515_v7, 0.0  ;;  %v604_v61 = vmax.f32 %v568_v54, 0.0  ;;  %v605_v47 = vmax.f32 %v571_v57, 0.0 }
 0x115   : > { %v639_v13 = vadd.f32 %v638_v10, %v637_v8  ;;  %v644_v25 = vsel %vm606_vm4, %v593_v14, 0.0  ;;  %v664_v0 = vsel %vm606_vm4, %v603_v58, 0.0  ;;  %v681_v10 = vld [vmem:[%s1370_s4] sm:$0x1] }
 0x116   : > { %v640_v16 = vsel %vm606_vm4, %v591_v11, 0.0  ;;  %v666_v37 = vsel %vm606_vm4, %v604_v61, 0.0  ;;  %v668_v3 = vsel %vm606_vm4, %v605_v47, 0.0 }
 0x117   : > { %v641_v18 = vadd.f32 %v640_v16, %v639_v13 }
 0x119   : > { %v643_v23 = vadd.f32 %v642_v19, %v641_v18 }
 0x11b   : > { %v645_v29 = vadd.f32 %v644_v25, %v643_v23 }
 0x11d   : > { %v647_v31 = vadd.f32 %v646_v26, %v645_v29 }
 0x11f   : > { %v649_v35 = vadd.f32 %v648_v33, %v647_v31 }
 0x121   : > { %v651_v39 = vadd.f32 %v650_v60, %v649_v35 }
 0x123   : > { %v653_v44 = vadd.f32 %v652_v38, %v651_v39 }
 0x125   : > { %v655_v22 = vadd.f32 %v654_v15, %v653_v44 }
 0x127   : > { %v657_v51 = vadd.f32 %v656_v49, %v655_v22 }
 0x129   : > { %v659_v56 = vadd.f32 %v658_v53, %v657_v51 }
 0x12b   : > { %v661_v59 = vadd.f32 %v660_v20, %v659_v56 }
 0x12d   : > { %v663_v63 = vadd.f32 %v662_v40, %v661_v59 }
 0x12f   : > { %v665_v1 = vadd.f32 %v664_v0, %v663_v63 }
 0x131   : > { %v667_v2 = vadd.f32 %v666_v37, %v665_v1 }
 0x133   : > { %v669_v4 = vadd.f32 %v668_v3, %v667_v2 }
 0x135   : > { %v670_v5 = vrot.slane %v669_v4, 4 }
 0x137   : > { %v671_v6 = vadd.f32 %v670_v5, %v669_v4 }
 0x139   : > { %v672_v7 = vrot.slane %v671_v6, 2 }
 0x13b   : > { %v673_v30 = vadd.f32 %v672_v7, %v671_v6 }
 0x13d   : > { %v674_v45 = vrot.slane %v673_v30, 1 }
 0x13f   : > { %v675_v8 = vadd.f32 %v674_v45, %v673_v30 }
 0x141   : > { %v676_v9 = vmul.f32 0.00390625, %v675_v8 }
 0x143   : > { %939 = vmatmul.mubr.msk.f32.vlgmr.msra.gmra.mrb[12].mxu1 %vm606_vm4, %v676_v9 }
 0x216   : > { %v751_v11 = vpop.f32.mrb[12].mxu1 }
 0x217   : > { %v752_v13 = vadd.f32 %v751_v11, %v681_v10  ;;  %v940_v14 = vpop.f32.mrb[13].mxu1 }
 0x219   : > { %756 = vst.msk [vmem:[%s216_s12] sm:$0x1] %vm755_vm5, %v752_v13 }
 0x21a   : > { %1025 = shalt.err (!%p1022_p3)
}
 0x21b   : > { %s1026_s30 = scalar_lea.hbm %s1324_s16, 16  ;;  %s1030_s8 = scalar_lea.hbm %s1371_s5, 32 }
 0x21c   : > { %p1027_p4 = scmp.ne.s32.totalorder %s1324_s16, %s1026_s30  ;;  %p1031_p9 = scmp.lt.u32.totalorder %s1324_s16, %s1371_s5 }
 0x21d   : > { %p1032_p10 = scmp.lt.u32.totalorder %s1030_s8, %s1026_s30  ;;  %p1034_p12 = scmp.lt.u32.totalorder %s1026_s30, %s1324_s16 }
 0x21e   : > { %p1028_p7 = pnand %p1027_p4, %p1149_p5 }
 0x21f   : > { %p1033_p11 = por %p1032_p10, %p1031_p9 }
 0x220   : > { %p1029_p8 = pneg %p1028_p7 }
 0x221   : > { %p1035_p13 = por %p1034_p12, %p1033_p11 }
 0x223   : > { %p1036_p0 = pnand %p1035_p13, %p1029_p8 }
 0x225   : > { %1039 = shalt.err (!%p1036_p0)
}
 0x226   : > { %951 = dma.vmem_to_hbm [thread:$0]  (%p1149_p5), %s1326_s13, 16, %s1324_s16, %s758_s17  }
 0x227 PF: > { %p957_p1 = scmp.ge.s32.totalorder %s1074_s21, 2  ;;  %s782_s11 = sand.u32 1, %s1062_s18  }
 0x228   : > { %s783_s12 = scalar_lea.sflag [#allocation3], %s782_s11 }
 0x229   : > { %p954_p2 = pnand %p957_p1, %p1153_p6 }
 0x22b   : > { %1057 = dma.done.wait (!%p954_p2), %s783_s12, 16  }
 0x22c   : > { %1059 = vsyncadd (!%p954_p2), %s783_s12, 4294967280  ;;  %p15_p3 = scmp.ge.s32.totalorder %s1136_s24, 4   ;;  %s1374_s18 = smov %s1066_s19 }
 0x22d   : > { %s1375_s19 = smov %s1070_s20  ;;  %s1376_s20 = smov %s1147_s27 }
 0x22e   : > { %s1377_s21 = smov %s1136_s24  ;;  %17 = sbr.rel (!%p15_p3) target bundleno = 3 (0x3), region = 75 }
 0x235   :  { %787 = vsyncpa [#allocation3], 1 }
 0x236   :  { %789 = vsyncpa [#allocation3 + $0x1], 1 }

</bundles_post_ra>
